<compile_context>
chip_gen: v5e
topology: v5e:2x2
jax: 0.10.0
libtpu: 0.0.40
codegen_flags: <defaults>
</compile_context>

<pallas_src>
import functools

import jax
import jax.numpy as jnp
from jax import lax
from jax.experimental import pallas as pl
from jax.experimental.pallas import tpu as pltpu

# ---------------- config (small, consistent with the module) ----------------
HIDDEN = 32
NUM_HEADS = 4
HEAD_SIZE = HIDDEN // NUM_HEADS            # 8
ROTARY_PCT = 0.25
ROT = int(HEAD_SIZE * ROTARY_PCT)          # 2
MAX_POS = 64
ROPE_BASE = 10000.0
BATCH = 2
SEQ = 8
NORM_FACTOR = float(jnp.sqrt(jnp.float32(HEAD_SIZE)))
MASK_VALUE = -1.0e9                        # matches self.masked_bias / _maskFunc


# ---------------------------- fused Pallas kernel ----------------------------
def fused_attn_kernel(x_ref, wqkv_ref, bqkv_ref, wdense_ref, bdense_ref,
                      cos_ref, sin_ref, bias_ref, o_ref, *, inv_norm):
    # One batch element per grid step; heads handled by a static unroll.
    x = x_ref[0]                                              # (S, H)
    qkv = jnp.dot(x, wqkv_ref[...],
                  preferred_element_type=jnp.float32) + bqkv_ref[...]   # (S, 3H)

    cos = cos_ref[0]                                          # (S, ROT)
    sin = sin_ref[0]                                          # (S, ROT)
    bias = bias_ref[0]                                        # (S, S) causal + mask

    half = ROT // 2

    def rope(t):                                              # t: (S, HEAD_SIZE)
        t_rot, t_pass = t[:, :ROT], t[:, ROT:]
        rot_half = jnp.concatenate([-t_rot[:, half:], t_rot[:, :half]], axis=-1)
        return jnp.concatenate([t_rot * cos + rot_half * sin, t_pass], axis=-1)

    acc = bdense_ref[...]                                     # (1, H), broadcasts
    for h in range(NUM_HEADS):
        base = 3 * HEAD_SIZE * h
        q = rope(qkv[:, base:base + HEAD_SIZE])               # (S, hd)
        k = rope(qkv[:, base + HEAD_SIZE:base + 2 * HEAD_SIZE])
        v = qkv[:, base + 2 * HEAD_SIZE:base + 3 * HEAD_SIZE]

        # scores = q @ k^T / norm_factor + (causal + additive attention mask)
        s = lax.dot_general(q, k, (((1,), (1,)), ((), ())),
                            preferred_element_type=jnp.float32) * inv_norm + bias
        s = s - jnp.max(s, axis=-1, keepdims=True)
        e = jnp.exp(s)
        p = e * pl.reciprocal(jnp.sum(e, axis=-1, keepdims=True), approx=True)

        ctx = jnp.dot(p, v, preferred_element_type=jnp.float32)          # (S, hd)
        # head-merge + dense projection folded in: rows h*hd:(h+1)*hd of W_dense
        acc = acc + jnp.dot(ctx,
                            wdense_ref[h * HEAD_SIZE:(h + 1) * HEAD_SIZE, :],
                            preferred_element_type=jnp.float32)
    o_ref[0] = acc.astype(o_ref.dtype)


# ------------------------------- glue / setup --------------------------------
def rope_cache():
    # GPTNeoXRotaryEmbedding._set_cos_sin_cache (no rope_scaling)
    inv_freq = 1.0 / (ROPE_BASE ** (jnp.arange(0, ROT, 2, dtype=jnp.float32) / ROT))
    t = jnp.arange(MAX_POS, dtype=jnp.float32)
    freqs = jnp.einsum("i,j->ij", t, inv_freq)
    emb = jnp.concatenate([freqs, freqs], axis=-1)            # (MAX_POS, ROT)
    return jnp.cos(emb), jnp.sin(emb)


def neox_attention_forward(hidden_states, attention_mask, position_ids, params):
    b, s, h = hidden_states.shape

    # rotary tables gathered by position_ids (rotary lanes only, no padding)
    cos_cache, sin_cache = rope_cache()
    cos = cos_cache[position_ids]                             # (B, S, ROT)
    sin = sin_cache[position_ids]                             # (B, S, ROT)

    # single additive bias: causal (-1e9 above diagonal) + attention_mask
    causal_add = jnp.where(jnp.tril(jnp.ones((s, s), jnp.bool_)), 0.0, MASK_VALUE)
    bias = causal_add[None, :, :] + attention_mask            # (B, S, S)

    kern = functools.partial(fused_attn_kernel, inv_norm=1.0 / NORM_FACTOR)
    return pl.pallas_call(
        kern,
        out_shape=jax.ShapeDtypeStruct((b, s, h), jnp.float32),
        grid=(b,),
        in_specs=[
            pl.BlockSpec((1, s, h), lambda bi: (bi, 0, 0)),       # hidden states
            pl.BlockSpec((h, 3 * h), lambda bi: (0, 0)),          # w_qkv
            pl.BlockSpec((1, 3 * h), lambda bi: (0, 0)),          # b_qkv
            pl.BlockSpec((h, h), lambda bi: (0, 0)),              # w_dense
            pl.BlockSpec((1, h), lambda bi: (0, 0)),              # b_dense
            pl.BlockSpec((1, s, ROT), lambda bi: (bi, 0, 0)),     # cos
            pl.BlockSpec((1, s, ROT), lambda bi: (bi, 0, 0)),     # sin
            pl.BlockSpec((1, s, s), lambda bi: (bi, 0, 0)),       # combined bias
        ],
        out_specs=pl.BlockSpec((1, s, h), lambda bi: (bi, 0, 0)),
        compiler_params=pltpu.CompilerParams(
            dimension_semantics=("parallel",)),
    )(hidden_states, params["w_qkv"], params["b_qkv"].reshape(1, 3 * h),
      params["w_dense"], params["b_dense"].reshape(1, h),
      cos, sin, bias)


# ------------------------- pure-JAX reference check ---------------------------
def reference_forward(x, attention_mask, position_ids, params):
    b, s, h = x.shape
    qkv = x @ params["w_qkv"] + params["b_qkv"]
    qkv = qkv.reshape(b, s, NUM_HEADS, 3 * HEAD_SIZE)
    q = jnp.transpose(qkv[..., :HEAD_SIZE], (0, 2, 1, 3))
    k = jnp.transpose(qkv[..., HEAD_SIZE:2 * HEAD_SIZE], (0, 2, 1, 3))
    v = jnp.transpose(qkv[..., 2 * HEAD_SIZE:], (0, 2, 1, 3))

    cos_cache, sin_cache = rope_cache()
    cos = cos_cache[position_ids][:, None]                    # (B,1,S,ROT)
    sin = sin_cache[position_ids][:, None]

    def rh(t):
        half = t.shape[-1] // 2
        return jnp.concatenate([-t[..., half:], t[..., :half]], axis=-1)

    q_rot, q_pass = q[..., :ROT], q[..., ROT:]
    k_rot, k_pass = k[..., :ROT], k[..., ROT:]
    q = jnp.concatenate([q_rot * cos + rh(q_rot) * sin, q_pass], axis=-1)
    k = jnp.concatenate([k_rot * cos + rh(k_rot) * sin, k_pass], axis=-1)

    scores = jnp.einsum("bhqd,bhkd->bhqk", q, k) / NORM_FACTOR
    cm = jnp.tril(jnp.ones((s, s), jnp.float32))
    scores = scores * cm + MASK_VALUE * (1.0 - cm)
    scores = scores + attention_mask[:, None]                 # (B,1,1,S) broadcast
    w = jax.nn.softmax(scores, axis=-1)
    out = jnp.einsum("bhqk,bhkd->bhqd", w, v)
    out = jnp.transpose(out, (0, 2, 1, 3)).reshape(b, s, h)
    return out @ params["w_dense"] + params["b_dense"]


if __name__ == "__main__":
    key = jax.random.PRNGKey(0)
    k1, k2, k3, k4, k5 = jax.random.split(key, 5)

    # deterministic parameter init (nn.Linear weights, stored as (in, out))
    params = {
        "w_qkv": 0.05 * jax.random.normal(k1, (HIDDEN, 3 * HIDDEN), jnp.float32),
        "b_qkv": 0.05 * jax.random.normal(k2, (3 * HIDDEN,), jnp.float32),
        "w_dense": 0.05 * jax.random.normal(k3, (HIDDEN, HIDDEN), jnp.float32),
        "b_dense": 0.05 * jax.random.normal(k4, (HIDDEN,), jnp.float32),
    }

    hidden_states = jax.random.normal(k5, (BATCH, SEQ, HIDDEN), jnp.float32)
    attention_mask = jnp.zeros((BATCH, 1, SEQ), jnp.float32)   # additive mask
    position_ids = jnp.broadcast_to(jnp.arange(SEQ), (BATCH, SEQ))

    out = neox_attention_forward(hidden_states, attention_mask, position_ids, params)
    out = jax.block_until_ready(out)

    ref = reference_forward(hidden_states, attention_mask, position_ids, params)
    assert out.shape == (BATCH, SEQ, HIDDEN)
    assert jnp.allclose(out, ref, atol=2e-3, rtol=2e-3), "mismatch vs reference"

    print("KERNEL_OK")
</pallas_src>

<mosaic_0001>
module attributes {stable_mosaic.version = 11 : i64} {
  func.func @fused_attn_kernel(%arg0: i32, %arg1: memref<1x8x32xf32, #tpu.memory_space<vmem>>, %arg2: memref<32x96xf32, #tpu.memory_space<vmem>>, %arg3: memref<1x96xf32, #tpu.memory_space<vmem>>, %arg4: memref<32x32xf32, #tpu.memory_space<vmem>>, %arg5: memref<1x32xf32, #tpu.memory_space<vmem>>, %arg6: memref<1x8x2xf32, #tpu.memory_space<vmem>>, %arg7: memref<1x8x2xf32, #tpu.memory_space<vmem>>, %arg8: memref<1x8x8xf32, #tpu.memory_space<vmem>>, %arg9: memref<1x8x32xf32, #tpu.memory_space<vmem>>) attributes {dimension_semantics = [#tpu.dimension_semantics<parallel>], iteration_bounds = array<i64: 2>, scalar_prefetch = 0 : i64, scratch_operands = 0 : i64, tpu.core_type = #tpu.core_type<tc>, window_params = [{transform_indices = @transform_0, window_bounds = array<i64: 1, 8, 32>}, {pipeline_mode = #tpu.pipeline_mode<synchronous>, transform_indices = @transform_1, window_bounds = array<i64: 32, 96>}, {pipeline_mode = #tpu.pipeline_mode<synchronous>, transform_indices = @transform_2, window_bounds = array<i64: 1, 96>}, {pipeline_mode = #tpu.pipeline_mode<synchronous>, transform_indices = @transform_3, window_bounds = array<i64: 32, 32>}, {pipeline_mode = #tpu.pipeline_mode<synchronous>, transform_indices = @transform_4, window_bounds = array<i64: 1, 32>}, {transform_indices = @transform_5, window_bounds = array<i64: 1, 8, 2>}, {transform_indices = @transform_6, window_bounds = array<i64: 1, 8, 2>}, {transform_indices = @transform_7, window_bounds = array<i64: 1, 8, 8>}, {transform_indices = @transform_8, window_bounds = array<i64: 1, 8, 32>}]} {
    %c0 = arith.constant 0 : index
    %c0_0 = arith.constant 0 : index
    %c0_1 = arith.constant 0 : index
    %0 = vector.load %arg1[%c0, %c0_0, %c0_1] : memref<1x8x32xf32, #tpu.memory_space<vmem>>, vector<1x8x32xf32>
    %1 = vector.shape_cast %0 : vector<1x8x32xf32> to vector<8x32xf32>
    %c0_2 = arith.constant 0 : index
    %c0_3 = arith.constant 0 : index
    %2 = vector.load %arg2[%c0_2, %c0_3] : memref<32x96xf32, #tpu.memory_space<vmem>>, vector<32x96xf32>
    %cst = arith.constant dense<0.000000e+00> : vector<8x96xf32>
    %3 = tpu.matmul %1, %2, %cst {dimension_numbers = #tpu.dot_dimension_numbers<[1], [0], [0], [1], [0, 0, 1, 1], [], []>} : vector<8x32xf32>, vector<32x96xf32>, vector<8x96xf32> -> vector<8x96xf32>
    %c0_4 = arith.constant 0 : index
    %c0_5 = arith.constant 0 : index
    %4 = vector.load %arg3[%c0_4, %c0_5] : memref<1x96xf32, #tpu.memory_space<vmem>>, vector<1x96xf32>
    %5 = vector.broadcast %4 : vector<1x96xf32> to vector<8x96xf32>
    %6 = arith.addf %3, %5 : vector<8x96xf32>
    %c0_6 = arith.constant 0 : index
    %c0_7 = arith.constant 0 : index
    %c0_8 = arith.constant 0 : index
    %7 = vector.load %arg6[%c0_6, %c0_7, %c0_8] : memref<1x8x2xf32, #tpu.memory_space<vmem>>, vector<1x8x2xf32>
    %8 = vector.shape_cast %7 : vector<1x8x2xf32> to vector<8x2xf32>
    %c0_9 = arith.constant 0 : index
    %c0_10 = arith.constant 0 : index
    %c0_11 = arith.constant 0 : index
    %9 = vector.load %arg7[%c0_9, %c0_10, %c0_11] : memref<1x8x2xf32, #tpu.memory_space<vmem>>, vector<1x8x2xf32>
    %10 = vector.shape_cast %9 : vector<1x8x2xf32> to vector<8x2xf32>
    %c0_12 = arith.constant 0 : index
    %c0_13 = arith.constant 0 : index
    %c0_14 = arith.constant 0 : index
    %11 = vector.load %arg8[%c0_12, %c0_13, %c0_14] : memref<1x8x8xf32, #tpu.memory_space<vmem>>, vector<1x8x8xf32>
    %12 = vector.shape_cast %11 : vector<1x8x8xf32> to vector<8x8xf32>
    %c0_15 = arith.constant 0 : index
    %c0_16 = arith.constant 0 : index
    %13 = vector.load %arg5[%c0_15, %c0_16] : memref<1x32xf32, #tpu.memory_space<vmem>>, vector<1x32xf32>
    %14 = vector.extract_strided_slice %6 {offsets = [0, 0], sizes = [8, 8], strides = [1, 1]} : vector<8x96xf32> to vector<8x8xf32>
    %15 = vector.extract_strided_slice %14 {offsets = [0, 0], sizes = [8, 2], strides = [1, 1]} : vector<8x8xf32> to vector<8x2xf32>
    %16 = vector.extract_strided_slice %14 {offsets = [0, 2], sizes = [8, 6], strides = [1, 1]} : vector<8x8xf32> to vector<8x6xf32>
    %17 = vector.extract_strided_slice %15 {offsets = [0, 1], sizes = [8, 1], strides = [1, 1]} : vector<8x2xf32> to vector<8x1xf32>
    %cst_17 = arith.constant 0.000000e+00 : f32
    %18 = vector.broadcast %cst_17 : f32 to vector<8x1xf32>
    %19 = arith.subf %18, %17 : vector<8x1xf32>
    %20 = vector.extract_strided_slice %15 {offsets = [0, 0], sizes = [8, 1], strides = [1, 1]} : vector<8x2xf32> to vector<8x1xf32>
    %21 = tpu.concatenate %19, %20 in 1 : vector<8x1xf32>, vector<8x1xf32> -> vector<8x2xf32>
    %22 = arith.mulf %15, %8 : vector<8x2xf32>
    %23 = arith.mulf %21, %10 : vector<8x2xf32>
    %24 = arith.addf %22, %23 : vector<8x2xf32>
    %25 = tpu.concatenate %24, %16 in 1 : vector<8x2xf32>, vector<8x6xf32> -> vector<8x8xf32>
    %26 = vector.extract_strided_slice %6 {offsets = [0, 8], sizes = [8, 8], strides = [1, 1]} : vector<8x96xf32> to vector<8x8xf32>
    %27 = vector.extract_strided_slice %26 {offsets = [0, 0], sizes = [8, 2], strides = [1, 1]} : vector<8x8xf32> to vector<8x2xf32>
    %28 = vector.extract_strided_slice %26 {offsets = [0, 2], sizes = [8, 6], strides = [1, 1]} : vector<8x8xf32> to vector<8x6xf32>
    %29 = vector.extract_strided_slice %27 {offsets = [0, 1], sizes = [8, 1], strides = [1, 1]} : vector<8x2xf32> to vector<8x1xf32>
    %cst_18 = arith.constant 0.000000e+00 : f32
    %30 = vector.broadcast %cst_18 : f32 to vector<8x1xf32>
    %31 = arith.subf %30, %29 : vector<8x1xf32>
    %32 = vector.extract_strided_slice %27 {offsets = [0, 0], sizes = [8, 1], strides = [1, 1]} : vector<8x2xf32> to vector<8x1xf32>
    %33 = tpu.concatenate %31, %32 in 1 : vector<8x1xf32>, vector<8x1xf32> -> vector<8x2xf32>
    %34 = arith.mulf %27, %8 : vector<8x2xf32>
    %35 = arith.mulf %33, %10 : vector<8x2xf32>
    %36 = arith.addf %34, %35 : vector<8x2xf32>
    %37 = tpu.concatenate %36, %28 in 1 : vector<8x2xf32>, vector<8x6xf32> -> vector<8x8xf32>
    %38 = vector.extract_strided_slice %6 {offsets = [0, 16], sizes = [8, 8], strides = [1, 1]} : vector<8x96xf32> to vector<8x8xf32>
    %cst_19 = arith.constant dense<0.000000e+00> : vector<8x8xf32>
    %39 = tpu.matmul %25, %37, %cst_19 {dimension_numbers = #tpu.dot_dimension_numbers<[1], [1], [0], [0], [0, 0, 1, 0], [], []>} : vector<8x8xf32>, vector<8x8xf32>, vector<8x8xf32> -> vector<8x8xf32>
    %cst_20 = arith.constant 0.353553385 : f32
    %40 = vector.broadcast %cst_20 : f32 to vector<8x8xf32>
    %41 = arith.mulf %39, %40 : vector<8x8xf32>
    %42 = arith.addf %41, %12 : vector<8x8xf32>
    %cst_21 = arith.constant dense<0xFF800000> : vector<8xf32>
    %43 = vector.multi_reduction <maximumf>, %42, %cst_21 [1] : vector<8x8xf32> to vector<8xf32>
    %44 = vector.shape_cast %43 : vector<8xf32> to vector<8x1xf32>
    %45 = vector.broadcast %44 : vector<8x1xf32> to vector<8x8xf32>
    %46 = arith.subf %42, %45 : vector<8x8xf32>
    %47 = math.exp %46 : vector<8x8xf32>
    %cst_22 = arith.constant dense<0.000000e+00> : vector<8xf32>
    %48 = vector.multi_reduction <add>, %47, %cst_22 [1] : vector<8x8xf32> to vector<8xf32>
    %49 = vector.shape_cast %48 : vector<8xf32> to vector<8x1xf32>
    %50 = tpu.reciprocal %49 {approx = true} : vector<8x1xf32> -> vector<8x1xf32>
    %51 = vector.broadcast %50 : vector<8x1xf32> to vector<8x8xf32>
    %52 = arith.mulf %47, %51 : vector<8x8xf32>
    %cst_23 = arith.constant dense<0.000000e+00> : vector<8x8xf32>
    %53 = tpu.matmul %52, %38, %cst_23 {dimension_numbers = #tpu.dot_dimension_numbers<[1], [0], [0], [1], [0, 0, 1, 1], [], []>} : vector<8x8xf32>, vector<8x8xf32>, vector<8x8xf32> -> vector<8x8xf32>
    %c0_24 = arith.constant 0 : index
    %c0_25 = arith.constant 0 : index
    %54 = vector.load %arg4[%c0_24, %c0_25] : memref<32x32xf32, #tpu.memory_space<vmem>>, vector<8x32xf32>
    %cst_26 = arith.constant dense<0.000000e+00> : vector<8x32xf32>
    %55 = tpu.matmul %53, %54, %cst_26 {dimension_numbers = #tpu.dot_dimension_numbers<[1], [0], [0], [1], [0, 0, 1, 1], [], []>} : vector<8x8xf32>, vector<8x32xf32>, vector<8x32xf32> -> vector<8x32xf32>
    %56 = vector.broadcast %13 : vector<1x32xf32> to vector<8x32xf32>
    %57 = arith.addf %56, %55 : vector<8x32xf32>
    %58 = vector.extract_strided_slice %6 {offsets = [0, 24], sizes = [8, 8], strides = [1, 1]} : vector<8x96xf32> to vector<8x8xf32>
    %59 = vector.extract_strided_slice %58 {offsets = [0, 0], sizes = [8, 2], strides = [1, 1]} : vector<8x8xf32> to vector<8x2xf32>
    %60 = vector.extract_strided_slice %58 {offsets = [0, 2], sizes = [8, 6], strides = [1, 1]} : vector<8x8xf32> to vector<8x6xf32>
    %61 = vector.extract_strided_slice %59 {offsets = [0, 1], sizes = [8, 1], strides = [1, 1]} : vector<8x2xf32> to vector<8x1xf32>
    %cst_27 = arith.constant 0.000000e+00 : f32
    %62 = vector.broadcast %cst_27 : f32 to vector<8x1xf32>
    %63 = arith.subf %62, %61 : vector<8x1xf32>
    %64 = vector.extract_strided_slice %59 {offsets = [0, 0], sizes = [8, 1], strides = [1, 1]} : vector<8x2xf32> to vector<8x1xf32>
    %65 = tpu.concatenate %63, %64 in 1 : vector<8x1xf32>, vector<8x1xf32> -> vector<8x2xf32>
    %66 = arith.mulf %59, %8 : vector<8x2xf32>
    %67 = arith.mulf %65, %10 : vector<8x2xf32>
    %68 = arith.addf %66, %67 : vector<8x2xf32>
    %69 = tpu.concatenate %68, %60 in 1 : vector<8x2xf32>, vector<8x6xf32> -> vector<8x8xf32>
    %70 = vector.extract_strided_slice %6 {offsets = [0, 32], sizes = [8, 8], strides = [1, 1]} : vector<8x96xf32> to vector<8x8xf32>
    %71 = vector.extract_strided_slice %70 {offsets = [0, 0], sizes = [8, 2], strides = [1, 1]} : vector<8x8xf32> to vector<8x2xf32>
    %72 = vector.extract_strided_slice %70 {offsets = [0, 2], sizes = [8, 6], strides = [1, 1]} : vector<8x8xf32> to vector<8x6xf32>
    %73 = vector.extract_strided_slice %71 {offsets = [0, 1], sizes = [8, 1], strides = [1, 1]} : vector<8x2xf32> to vector<8x1xf32>
    %cst_28 = arith.constant 0.000000e+00 : f32
    %74 = vector.broadcast %cst_28 : f32 to vector<8x1xf32>
    %75 = arith.subf %74, %73 : vector<8x1xf32>
    %76 = vector.extract_strided_slice %71 {offsets = [0, 0], sizes = [8, 1], strides = [1, 1]} : vector<8x2xf32> to vector<8x1xf32>
    %77 = tpu.concatenate %75, %76 in 1 : vector<8x1xf32>, vector<8x1xf32> -> vector<8x2xf32>
    %78 = arith.mulf %71, %8 : vector<8x2xf32>
    %79 = arith.mulf %77, %10 : vector<8x2xf32>
    %80 = arith.addf %78, %79 : vector<8x2xf32>
    %81 = tpu.concatenate %80, %72 in 1 : vector<8x2xf32>, vector<8x6xf32> -> vector<8x8xf32>
    %82 = vector.extract_strided_slice %6 {offsets = [0, 40], sizes = [8, 8], strides = [1, 1]} : vector<8x96xf32> to vector<8x8xf32>
    %cst_29 = arith.constant dense<0.000000e+00> : vector<8x8xf32>
    %83 = tpu.matmul %69, %81, %cst_29 {dimension_numbers = #tpu.dot_dimension_numbers<[1], [1], [0], [0], [0, 0, 1, 0], [], []>} : vector<8x8xf32>, vector<8x8xf32>, vector<8x8xf32> -> vector<8x8xf32>
    %cst_30 = arith.constant 0.353553385 : f32
    %84 = vector.broadcast %cst_30 : f32 to vector<8x8xf32>
    %85 = arith.mulf %83, %84 : vector<8x8xf32>
    %86 = arith.addf %85, %12 : vector<8x8xf32>
    %cst_31 = arith.constant dense<0xFF800000> : vector<8xf32>
    %87 = vector.multi_reduction <maximumf>, %86, %cst_31 [1] : vector<8x8xf32> to vector<8xf32>
    %88 = vector.shape_cast %87 : vector<8xf32> to vector<8x1xf32>
    %89 = vector.broadcast %88 : vector<8x1xf32> to vector<8x8xf32>
    %90 = arith.subf %86, %89 : vector<8x8xf32>
    %91 = math.exp %90 : vector<8x8xf32>
    %cst_32 = arith.constant dense<0.000000e+00> : vector<8xf32>
    %92 = vector.multi_reduction <add>, %91, %cst_32 [1] : vector<8x8xf32> to vector<8xf32>
    %93 = vector.shape_cast %92 : vector<8xf32> to vector<8x1xf32>
    %94 = tpu.reciprocal %93 {approx = true} : vector<8x1xf32> -> vector<8x1xf32>
    %95 = vector.broadcast %94 : vector<8x1xf32> to vector<8x8xf32>
    %96 = arith.mulf %91, %95 : vector<8x8xf32>
    %cst_33 = arith.constant dense<0.000000e+00> : vector<8x8xf32>
    %97 = tpu.matmul %96, %82, %cst_33 {dimension_numbers = #tpu.dot_dimension_numbers<[1], [0], [0], [1], [0, 0, 1, 1], [], []>} : vector<8x8xf32>, vector<8x8xf32>, vector<8x8xf32> -> vector<8x8xf32>
    %c8 = arith.constant 8 : index
    %c0_34 = arith.constant 0 : index
    %98 = vector.load %arg4[%c8, %c0_34] : memref<32x32xf32, #tpu.memory_space<vmem>>, vector<8x32xf32>
    %cst_35 = arith.constant dense<0.000000e+00> : vector<8x32xf32>
    %99 = tpu.matmul %97, %98, %cst_35 {dimension_numbers = #tpu.dot_dimension_numbers<[1], [0], [0], [1], [0, 0, 1, 1], [], []>} : vector<8x8xf32>, vector<8x32xf32>, vector<8x32xf32> -> vector<8x32xf32>
    %100 = arith.addf %57, %99 : vector<8x32xf32>
    %101 = vector.extract_strided_slice %6 {offsets = [0, 48], sizes = [8, 8], strides = [1, 1]} : vector<8x96xf32> to vector<8x8xf32>
    %102 = vector.extract_strided_slice %101 {offsets = [0, 0], sizes = [8, 2], strides = [1, 1]} : vector<8x8xf32> to vector<8x2xf32>
    %103 = vector.extract_strided_slice %101 {offsets = [0, 2], sizes = [8, 6], strides = [1, 1]} : vector<8x8xf32> to vector<8x6xf32>
    %104 = vector.extract_strided_slice %102 {offsets = [0, 1], sizes = [8, 1], strides = [1, 1]} : vector<8x2xf32> to vector<8x1xf32>
    %cst_36 = arith.constant 0.000000e+00 : f32
    %105 = vector.broadcast %cst_36 : f32 to vector<8x1xf32>
    %106 = arith.subf %105, %104 : vector<8x1xf32>
    %107 = vector.extract_strided_slice %102 {offsets = [0, 0], sizes = [8, 1], strides = [1, 1]} : vector<8x2xf32> to vector<8x1xf32>
    %108 = tpu.concatenate %106, %107 in 1 : vector<8x1xf32>, vector<8x1xf32> -> vector<8x2xf32>
    %109 = arith.mulf %102, %8 : vector<8x2xf32>
    %110 = arith.mulf %108, %10 : vector<8x2xf32>
    %111 = arith.addf %109, %110 : vector<8x2xf32>
    %112 = tpu.concatenate %111, %103 in 1 : vector<8x2xf32>, vector<8x6xf32> -> vector<8x8xf32>
    %113 = vector.extract_strided_slice %6 {offsets = [0, 56], sizes = [8, 8], strides = [1, 1]} : vector<8x96xf32> to vector<8x8xf32>
    %114 = vector.extract_strided_slice %113 {offsets = [0, 0], sizes = [8, 2], strides = [1, 1]} : vector<8x8xf32> to vector<8x2xf32>
    %115 = vector.extract_strided_slice %113 {offsets = [0, 2], sizes = [8, 6], strides = [1, 1]} : vector<8x8xf32> to vector<8x6xf32>
    %116 = vector.extract_strided_slice %114 {offsets = [0, 1], sizes = [8, 1], strides = [1, 1]} : vector<8x2xf32> to vector<8x1xf32>
    %cst_37 = arith.constant 0.000000e+00 : f32
    %117 = vector.broadcast %cst_37 : f32 to vector<8x1xf32>
    %118 = arith.subf %117, %116 : vector<8x1xf32>
    %119 = vector.extract_strided_slice %114 {offsets = [0, 0], sizes = [8, 1], strides = [1, 1]} : vector<8x2xf32> to vector<8x1xf32>
    %120 = tpu.concatenate %118, %119 in 1 : vector<8x1xf32>, vector<8x1xf32> -> vector<8x2xf32>
    %121 = arith.mulf %114, %8 : vector<8x2xf32>
    %122 = arith.mulf %120, %10 : vector<8x2xf32>
    %123 = arith.addf %121, %122 : vector<8x2xf32>
    %124 = tpu.concatenate %123, %115 in 1 : vector<8x2xf32>, vector<8x6xf32> -> vector<8x8xf32>
    %125 = vector.extract_strided_slice %6 {offsets = [0, 64], sizes = [8, 8], strides = [1, 1]} : vector<8x96xf32> to vector<8x8xf32>
    %cst_38 = arith.constant dense<0.000000e+00> : vector<8x8xf32>
    %126 = tpu.matmul %112, %124, %cst_38 {dimension_numbers = #tpu.dot_dimension_numbers<[1], [1], [0], [0], [0, 0, 1, 0], [], []>} : vector<8x8xf32>, vector<8x8xf32>, vector<8x8xf32> -> vector<8x8xf32>
    %cst_39 = arith.constant 0.353553385 : f32
    %127 = vector.broadcast %cst_39 : f32 to vector<8x8xf32>
    %128 = arith.mulf %126, %127 : vector<8x8xf32>
    %129 = arith.addf %128, %12 : vector<8x8xf32>
    %cst_40 = arith.constant dense<0xFF800000> : vector<8xf32>
    %130 = vector.multi_reduction <maximumf>, %129, %cst_40 [1] : vector<8x8xf32> to vector<8xf32>
    %131 = vector.shape_cast %130 : vector<8xf32> to vector<8x1xf32>
    %132 = vector.broadcast %131 : vector<8x1xf32> to vector<8x8xf32>
    %133 = arith.subf %129, %132 : vector<8x8xf32>
    %134 = math.exp %133 : vector<8x8xf32>
    %cst_41 = arith.constant dense<0.000000e+00> : vector<8xf32>
    %135 = vector.multi_reduction <add>, %134, %cst_41 [1] : vector<8x8xf32> to vector<8xf32>
    %136 = vector.shape_cast %135 : vector<8xf32> to vector<8x1xf32>
    %137 = tpu.reciprocal %136 {approx = true} : vector<8x1xf32> -> vector<8x1xf32>
    %138 = vector.broadcast %137 : vector<8x1xf32> to vector<8x8xf32>
    %139 = arith.mulf %134, %138 : vector<8x8xf32>
    %cst_42 = arith.constant dense<0.000000e+00> : vector<8x8xf32>
    %140 = tpu.matmul %139, %125, %cst_42 {dimension_numbers = #tpu.dot_dimension_numbers<[1], [0], [0], [1], [0, 0, 1, 1], [], []>} : vector<8x8xf32>, vector<8x8xf32>, vector<8x8xf32> -> vector<8x8xf32>
    %c16 = arith.constant 16 : index
    %c0_43 = arith.constant 0 : index
    %141 = vector.load %arg4[%c16, %c0_43] : memref<32x32xf32, #tpu.memory_space<vmem>>, vector<8x32xf32>
    %cst_44 = arith.constant dense<0.000000e+00> : vector<8x32xf32>
    %142 = tpu.matmul %140, %141, %cst_44 {dimension_numbers = #tpu.dot_dimension_numbers<[1], [0], [0], [1], [0, 0, 1, 1], [], []>} : vector<8x8xf32>, vector<8x32xf32>, vector<8x32xf32> -> vector<8x32xf32>
    %143 = arith.addf %100, %142 : vector<8x32xf32>
    %144 = vector.extract_strided_slice %6 {offsets = [0, 72], sizes = [8, 8], strides = [1, 1]} : vector<8x96xf32> to vector<8x8xf32>
    %145 = vector.extract_strided_slice %144 {offsets = [0, 0], sizes = [8, 2], strides = [1, 1]} : vector<8x8xf32> to vector<8x2xf32>
    %146 = vector.extract_strided_slice %144 {offsets = [0, 2], sizes = [8, 6], strides = [1, 1]} : vector<8x8xf32> to vector<8x6xf32>
    %147 = vector.extract_strided_slice %145 {offsets = [0, 1], sizes = [8, 1], strides = [1, 1]} : vector<8x2xf32> to vector<8x1xf32>
    %cst_45 = arith.constant 0.000000e+00 : f32
    %148 = vector.broadcast %cst_45 : f32 to vector<8x1xf32>
    %149 = arith.subf %148, %147 : vector<8x1xf32>
    %150 = vector.extract_strided_slice %145 {offsets = [0, 0], sizes = [8, 1], strides = [1, 1]} : vector<8x2xf32> to vector<8x1xf32>
    %151 = tpu.concatenate %149, %150 in 1 : vector<8x1xf32>, vector<8x1xf32> -> vector<8x2xf32>
    %152 = arith.mulf %145, %8 : vector<8x2xf32>
    %153 = arith.mulf %151, %10 : vector<8x2xf32>
    %154 = arith.addf %152, %153 : vector<8x2xf32>
    %155 = tpu.concatenate %154, %146 in 1 : vector<8x2xf32>, vector<8x6xf32> -> vector<8x8xf32>
    %156 = vector.extract_strided_slice %6 {offsets = [0, 80], sizes = [8, 8], strides = [1, 1]} : vector<8x96xf32> to vector<8x8xf32>
    %157 = vector.extract_strided_slice %156 {offsets = [0, 0], sizes = [8, 2], strides = [1, 1]} : vector<8x8xf32> to vector<8x2xf32>
    %158 = vector.extract_strided_slice %156 {offsets = [0, 2], sizes = [8, 6], strides = [1, 1]} : vector<8x8xf32> to vector<8x6xf32>
    %159 = vector.extract_strided_slice %157 {offsets = [0, 1], sizes = [8, 1], strides = [1, 1]} : vector<8x2xf32> to vector<8x1xf32>
    %cst_46 = arith.constant 0.000000e+00 : f32
    %160 = vector.broadcast %cst_46 : f32 to vector<8x1xf32>
    %161 = arith.subf %160, %159 : vector<8x1xf32>
    %162 = vector.extract_strided_slice %157 {offsets = [0, 0], sizes = [8, 1], strides = [1, 1]} : vector<8x2xf32> to vector<8x1xf32>
    %163 = tpu.concatenate %161, %162 in 1 : vector<8x1xf32>, vector<8x1xf32> -> vector<8x2xf32>
    %164 = arith.mulf %157, %8 : vector<8x2xf32>
    %165 = arith.mulf %163, %10 : vector<8x2xf32>
    %166 = arith.addf %164, %165 : vector<8x2xf32>
    %167 = tpu.concatenate %166, %158 in 1 : vector<8x2xf32>, vector<8x6xf32> -> vector<8x8xf32>
    %168 = vector.extract_strided_slice %6 {offsets = [0, 88], sizes = [8, 8], strides = [1, 1]} : vector<8x96xf32> to vector<8x8xf32>
    %cst_47 = arith.constant dense<0.000000e+00> : vector<8x8xf32>
    %169 = tpu.matmul %155, %167, %cst_47 {dimension_numbers = #tpu.dot_dimension_numbers<[1], [1], [0], [0], [0, 0, 1, 0], [], []>} : vector<8x8xf32>, vector<8x8xf32>, vector<8x8xf32> -> vector<8x8xf32>
    %cst_48 = arith.constant 0.353553385 : f32
    %170 = vector.broadcast %cst_48 : f32 to vector<8x8xf32>
    %171 = arith.mulf %169, %170 : vector<8x8xf32>
    %172 = arith.addf %171, %12 : vector<8x8xf32>
    %cst_49 = arith.constant dense<0xFF800000> : vector<8xf32>
    %173 = vector.multi_reduction <maximumf>, %172, %cst_49 [1] : vector<8x8xf32> to vector<8xf32>
    %174 = vector.shape_cast %173 : vector<8xf32> to vector<8x1xf32>
    %175 = vector.broadcast %174 : vector<8x1xf32> to vector<8x8xf32>
    %176 = arith.subf %172, %175 : vector<8x8xf32>
    %177 = math.exp %176 : vector<8x8xf32>
    %cst_50 = arith.constant dense<0.000000e+00> : vector<8xf32>
    %178 = vector.multi_reduction <add>, %177, %cst_50 [1] : vector<8x8xf32> to vector<8xf32>
    %179 = vector.shape_cast %178 : vector<8xf32> to vector<8x1xf32>
    %180 = tpu.reciprocal %179 {approx = true} : vector<8x1xf32> -> vector<8x1xf32>
    %181 = vector.broadcast %180 : vector<8x1xf32> to vector<8x8xf32>
    %182 = arith.mulf %177, %181 : vector<8x8xf32>
    %cst_51 = arith.constant dense<0.000000e+00> : vector<8x8xf32>
    %183 = tpu.matmul %182, %168, %cst_51 {dimension_numbers = #tpu.dot_dimension_numbers<[1], [0], [0], [1], [0, 0, 1, 1], [], []>} : vector<8x8xf32>, vector<8x8xf32>, vector<8x8xf32> -> vector<8x8xf32>
    %c24 = arith.constant 24 : index
    %c0_52 = arith.constant 0 : index
    %184 = vector.load %arg4[%c24, %c0_52] : memref<32x32xf32, #tpu.memory_space<vmem>>, vector<8x32xf32>
    %cst_53 = arith.constant dense<0.000000e+00> : vector<8x32xf32>
    %185 = tpu.matmul %183, %184, %cst_53 {dimension_numbers = #tpu.dot_dimension_numbers<[1], [0], [0], [1], [0, 0, 1, 1], [], []>} : vector<8x8xf32>, vector<8x32xf32>, vector<8x32xf32> -> vector<8x32xf32>
    %186 = arith.addf %143, %185 : vector<8x32xf32>
    %c0_54 = arith.constant 0 : index
    %c0_55 = arith.constant 0 : index
    %c0_56 = arith.constant 0 : index
    %187 = vector.load %arg9[%c0_54, %c0_55, %c0_56] : memref<1x8x32xf32, #tpu.memory_space<vmem>>, vector<1x8x32xf32>
    %188 = vector.shape_cast %187 : vector<1x8x32xf32> to vector<8x32xf32>
    %189 = vector.shape_cast %186 : vector<8x32xf32> to vector<1x8x32xf32>
    tpu.vector_store %arg9[%c0_54, %c0_55, %c0_56], %189 {strides = array<i32>} : memref<1x8x32xf32, #tpu.memory_space<vmem>>, vector<1x8x32xf32>,
    return
  }
  func.func @transform_0(%arg0: i32) -> (i32, i32, i32) {
    %c0_i32 = arith.constant 0 : i32
    %c0_i32_0 = arith.constant 0 : i32
    %c0_i32_1 = arith.constant 0 : i32
    return %arg0, %c0_i32, %c0_i32_0 : i32, i32, i32
  }
  func.func @transform_1(%arg0: i32) -> (i32, i32) {
    %c0_i32 = arith.constant 0 : i32
    %c0_i32_0 = arith.constant 0 : i32
    %c0_i32_1 = arith.constant 0 : i32
    return %c0_i32, %c0_i32_0 : i32, i32
  }
  func.func @transform_2(%arg0: i32) -> (i32, i32) {
    %c0_i32 = arith.constant 0 : i32
    %c0_i32_0 = arith.constant 0 : i32
    %c0_i32_1 = arith.constant 0 : i32
    return %c0_i32, %c0_i32_0 : i32, i32
  }
  func.func @transform_3(%arg0: i32) -> (i32, i32) {
    %c0_i32 = arith.constant 0 : i32
    %c0_i32_0 = arith.constant 0 : i32
    %c0_i32_1 = arith.constant 0 : i32
    return %c0_i32, %c0_i32_0 : i32, i32
  }
  func.func @transform_4(%arg0: i32) -> (i32, i32) {
    %c0_i32 = arith.constant 0 : i32
    %c0_i32_0 = arith.constant 0 : i32
    %c0_i32_1 = arith.constant 0 : i32
    return %c0_i32, %c0_i32_0 : i32, i32
  }
  func.func @transform_5(%arg0: i32) -> (i32, i32, i32) {
    %c0_i32 = arith.constant 0 : i32
    %c0_i32_0 = arith.constant 0 : i32
    %c0_i32_1 = arith.constant 0 : i32
    return %arg0, %c0_i32, %c0_i32_0 : i32, i32, i32
  }
  func.func @transform_6(%arg0: i32) -> (i32, i32, i32) {
    %c0_i32 = arith.constant 0 : i32
    %c0_i32_0 = arith.constant 0 : i32
    %c0_i32_1 = arith.constant 0 : i32
    return %arg0, %c0_i32, %c0_i32_0 : i32, i32, i32
  }
  func.func @transform_7(%arg0: i32) -> (i32, i32, i32) {
    %c0_i32 = arith.constant 0 : i32
    %c0_i32_0 = arith.constant 0 : i32
    %c0_i32_1 = arith.constant 0 : i32
    return %arg0, %c0_i32, %c0_i32_0 : i32, i32, i32
  }
  func.func @transform_8(%arg0: i32) -> (i32, i32, i32) {
    %c0_i32 = arith.constant 0 : i32
    %c0_i32_0 = arith.constant 0 : i32
    %c0_i32_1 = arith.constant 0 : i32
    return %arg0, %c0_i32, %c0_i32_0 : i32, i32, i32
  }
}

</mosaic_0001>

<bundles_post_ra>
// kernel: tpu_custom_call.1
= control target key start
LH: loop header
LB: loop body
LE: loop exit
PB: predicated region body
PF: predicated region fallthrough
CT: control target
= control target key end

     0   :  { %s1884_s0 = inlined_call_operand.hbm [shape: f32[2,8,32], index: 0, kind: input, shape index: {}]   ;;  %s1885_s1 = inlined_call_operand.vmem [shape: f32[32,96], index: 1, kind: input, shape index: {}]   ;;  %s1886_s2 = inlined_call_operand.vmem [shape: f32[1,96], index: 2, kind: input, shape index: {}]   ;;  %s1887_s3 = inlined_call_operand.hbm [shape: f32[32,32], index: 3, kind: input, shape index: {}]   ;;  %s1888_s4 = inlined_call_operand.vmem [shape: f32[1,32], index: 4, kind: input, shape index: {}]   ;;  %s1889_s5 = inlined_call_operand.vmem [shape: f32[2,8,2], index: 5, kind: input, shape index: {}]   ;;  %s1890_s6 = inlined_call_operand.vmem [shape: f32[2,8,2], index: 6, kind: input, shape index: {}]   ;;  %s1891_s7 = inlined_call_operand.hbm [shape: f32[2,8,8], index: 7, kind: input, shape index: {}]   ;;  %s1892_s8 = inlined_call_operand.hbm [shape: f32[2,8,32], index: 8, kind: output, shape index: {}]  }
   0x1   :  { %1898 = sst [smem:[#allocation17_spill]] %s1884_s0 }
   0x2   :  { %1899 = sst [smem:[#allocation18_spill]] %s1887_s3 }
   0x3   :  { %13 = vsyncpa [#allocation3], 0 }
   0x4   :  { %15 = vsyncpa [#allocation3 + $0x1], 0 }
   0x5   :  { %16 = vsyncpa [#allocation6], 0 }
   0x6   :  { %17 = vsyncpa [#allocation4], 0 }
   0x7   :  { %19 = vsyncpa [#allocation4 + $0x1], 0  ;;  %s1536_s27 = smov 0   ;;  %s1538_s28 = smov 0  }
   0x8   :  { %s1540_s29 = smov 0   ;;  %s1542_s30 = smov 0  }
   0x9 LB: > { %1900 = sst [smem:[#allocation13_spill]] %s1452_s29  ;;  %s1557_s9 = sadd.s32 4294967295, %s1456_s30   ;;  %s1456_s30 = sphi %s1542_s30, %s1916_s30   ;;  %s1452_s29 = sphi %s1540_s29, %s1918_s29   ;;  %s1448_s28 = sphi %s1538_s28, %s1920_s28   ;;  %s1444_s27 = sphi %s1536_s27, %s1919_s27  }
   0xa   : > { %1901 = sst [smem:[#allocation14_spill]] %s1456_s30  ;;  %s1144_s10 = sadd.s32 4294967294, %s1456_s30  }
   0xb   : > { %s1561_s11 = sadd.s32 1, %s1456_s30   ;;  %s32_s12 = sadd.s32 1, %s1452_s29 }
   0xc   : > { %1902 = sst [smem:[#allocation15_spill]] %s1561_s11  ;;  %s29_s13 = ssub.s32 %s1456_s30, %s1561_s11 }
   0xd   : > { %p39_p0 = scmp.ne.s32.totalorder %s1452_s29, %s1448_s28  ;;  %p30_p1 = scmp.eq.s32.totalorder %s29_s13, 0 }
   0xe   : > { %p40_p2 = scmp.eq.s32.totalorder %s1456_s30, 0  ;;  %p45_p3 = scmp.ne.s32.totalorder %s1448_s28, %s1444_s27 }
   0xf   : > { %p231_p4 = scmp.eq.s32.totalorder %s1557_s9, 1  ;;  %p237_p6 = scmp.eq.s32.totalorder %s1144_s10, 1 }
  0x10   : > { %s1573_s14 = scalar_select %p30_p1, %s1452_s29, %s32_s12  }
  0x11   : > { %p1575_p5 = por %p231_p4, %p39_p0  ;;  %p1579_p7 = por %p40_p2, %p39_p0 }
  0x12   : > { %1903 = sst [smem:[#allocation16_spill]] %s1573_s14  ;;  %p1587_p9 = por %p237_p6, %p45_p3 }
  0x13   : > { %p1206_p10 = scmp.lt.s32.totalorder %s1456_s30, 2  ;;  %s280_s18 = sand.u32 1, %s1456_s30  }
  0x14   : > { %s282_s19 = sand.u32 1, %s1452_s29   ;;  %s1149_s21 = sshll.u32 %s1456_s30, 3 }
  0x15   : > { %s1594_s20 = sshll.u32 %s282_s19, 3  ;;  %s1907_s0 = sld [smem:[#allocation17_spill]] }
  0x16   : > { %s284_s26 = scalar_lea.vmem [#allocation2], %s1594_s20  ;;  %p1603_p11 = pnand %p1206_p10, %p1579_p7 }
  0x17   : > { %s292_s10 = sshll.u32 %s284_s26, 4  ;;  %p1897_p12 = scmp.eq.s32.totalorder %s1557_s9, 0  ;;  %s293_s10 = int_to_ptr.vmem [resolvable:$true] %s292_s10 }
  0x18   : > { %p1145_p13 = scmp.ge.s32.totalorder %s1456_s30, 1  ;;  %s1609_s13 = scalar_lea.sflag [#allocation3], %s280_s18 }
  0x19   : > { %p1296_p1 = pneg %p1603_p11 }
  0x1b   : > { %s288_s24 = scalar_lea.hbm %s1907_s0, %s1149_s21 }
  0x1c   : > { %s290_s25 = sshll.u32 %s288_s24, 4  ;;  %s1299_s24 = scalar_lea.hbm %s1907_s0, 16  ;;  %s291_s25 = int_to_ptr.hbm [resolvable:$true] %s290_s25 }
  0x1d   : > { %s1292_s19 = sshra.s32 %s291_s25, 4  ;;  %s1293_s19 = int_to_ptr.hbm [resolvable:$true] %s1292_s19 }
  0x1e   : > { %s1294_s22 = scalar_lea.hbm %s1293_s19, 8  ;;  %p1300_p6 = scmp.lt.s32.totalorder %s1293_s19, %s1907_s0 }
  0x1f   : > { %p1295_p0 = scmp.ne.s32.totalorder %s1293_s19, %s1294_s22  ;;  %p1301_p7 = scmp.lt.s32.totalorder %s1299_s24, %s1294_s22 }
  0x21   : > { %p1297_p2 = pnand %p1296_p1, %p1295_p0  ;;  %p1302_p10 = por %p1301_p7, %p1300_p6 }
  0x23   : > { %p1298_p4 = pneg %p1297_p2 }
  0x25   : > { %p1303_p8 = pnand %p1302_p10, %p1298_p4 }
  0x27   : > { %1306 = shalt.err (!%p1303_p8)
}
  0x28   : > { %1197 = dma.hbm_to_vmem [thread:$0]  (!%p1603_p11), %s291_s25, 128, %s293_s10, %s1609_s13  }
  0x29   : > { %p1630_p0 = por %p1897_p12, %p45_p3  ;;  %p244_p2 = scmp.lt.s32.totalorder %s1456_s30, 3 }
  0x2a   : > { %s1910_s3 = sld [smem:[#allocation18_spill]]  ;;  %s321_s24 = scalar_lea.hbm %s1891_s7, %s1149_s21 }
  0x2b   : > { %p1643_p8 = pnand %p1145_p13, %p244_p2  ;;  %s1458_s25 = smov [#allocation5]  }
  0x2c   : > { %s263_s10 = sshll.u32 %s1458_s25, 4  ;;  %s323_s0 = sshll.u32 %s321_s24, 4  ;;  %s264_s10 = int_to_ptr.vmem [resolvable:$true] %s263_s10  ;;  %s324_s0 = int_to_ptr.hbm [resolvable:$true] %s323_s0 }
  0x2d   : > { %p1190_p3 = pneg %p1643_p8  ;;  %s317_s18 = scalar_lea.vmem [#allocation7], %s1594_s20 }
  0x2e   : > { %s325_s19 = sshll.u32 %s317_s18, 4  ;;  %s1459_s21 = smov 128   ;;  %s326_s19 = int_to_ptr.vmem [resolvable:$true] %s325_s19 }
  0x2f   : > { %p1191_p4 = pnand %p1190_p3, %p1897_p12  ;;  %s1460_s16 = smov 8  }
  0x30   : > { %s261_s22 = sshll.u32 %s1910_s3, 4  ;;  %s1352_s23 = sshra.s32 %s324_s0, 4  ;;  %s262_s22 = int_to_ptr.hbm [resolvable:$true] %s261_s22  ;;  %s1353_s23 = int_to_ptr.hbm [resolvable:$true] %s1352_s23 }
  0x31   : > { %1193 = dma.hbm_to_vmem [thread:$0]  (!%p1191_p4), %s262_s22, 512, %s264_s10, [#allocation6], %s1459_s21, %s1459_s21, %s1460_s16  }
  0x32   : > { %s1354_s3 = scalar_lea.hbm %s1353_s23, 8  ;;  %s1359_s24 = scalar_lea.hbm %s1891_s7, 16 }
  0x33   : > { %p1355_p13 = scmp.ne.s32.totalorder %s1353_s23, %s1354_s3  ;;  %p1360_p10 = scmp.lt.s32.totalorder %s1353_s23, %s1891_s7 }
  0x34   : > { %p1361_p2 = scmp.lt.s32.totalorder %s1359_s24, %s1354_s3 }
  0x35   : > { %p1357_p6 = pnand %p1355_p13, %p1296_p1 }
  0x36   : > { %p1362_p3 = por %p1361_p2, %p1360_p10 }
  0x37   : > { %p1358_p7 = pneg %p1357_p6 }
  0x39   : > { %p1363_p12 = pnand %p1362_p3, %p1358_p7 }
  0x3b   : > { %1366 = shalt.err (!%p1363_p12)
}
  0x3c   : > { %1200 = dma.hbm_to_vmem [thread:$0]  (!%p1603_p11), %s324_s0, 128, %s326_s19, %s1609_s13  }
  0x3d   : > { %334 = sbr.rel (%p1643_p8) target bundleno = 2269 (0x8dd), region = 52  ;;  %s336_s29 = sand.u32 (!%p1643_p8), 1, %s1557_s9  }
  0x3e   : > { %s338_s20 = sand.u32 (!%p1643_p8), 1, %s1448_s28   ;;  %s337_s3 = scalar_lea.sflag (!%p1643_p8), [#allocation3], %s336_s29 }
  0x3f   : > { %s1670_s30 = sshll.u32 (!%p1643_p8), %s338_s20, 3 }
  0x40   : > { %s340_s11 = scalar_lea.vmem (!%p1643_p8), [#allocation2], %s1670_s30 }
  0x42   : > { %1427 = dma.done.wait (%p1630_p0), %s337_s3, 128  }
  0x43   : > { %1429 = vsyncadd (%p1630_p0), %s337_s3, 4294967168  ;;  %p1912_p11 = scmp.eq.s32.totalorder %s1557_s9, 0 }
  0x45   : > { %1431 = dma.done.wait (%p1912_p11), [#allocation6], 512   ;;  %p1913_p12 = pmov %p1912_p11 }
  0x46   : > { %s355_s0 = scalar_lea.vmem [#allocation7], %s1670_s30 }
  0x47   : > { %1433 = vsyncadd (%p1913_p12), [#allocation6], 4294966784 }
  0x48   : > { %1435 = dma.done.wait (%p1630_p0), %s337_s3, 128  }
  0x49   : > { %1437 = vsyncadd (%p1630_p0), %s337_s3, 4294967168  ;;  %p402_p1 = scmp.lt.s32.totalorder %s1557_s9, 1  ;;  %v414_v0 = vld [vmem:[%s1885_s1 + $0x18] sm:$0xff]  ;;  %v413_v1 = vld [vmem:[%s1885_s1 + $0x10] sm:$0xff]  ;;  %s1461_s25 = smov 8   ;;  %vm419_vm0 = vcmask 261120  }
  0x4a   : > { %435 = vmatpush.msra.mxu0 %v414_v0  ;;  %v412_v2 = vld [vmem:[%s1885_s1 + $0x8] sm:$0xff]  ;;  %v411_v4 = vld [vmem:[%s1885_s1] sm:$0xff]  ;;  %s1462_s26 = smov 127   ;;  %s1465_s18 = smov 121   ;;  %vm456_vm1 = vcmask 7168   ;;  %vm489_vm2 = vcmask 64512  }
  0x4b   : > { %s1688_s12 = scalar_select %p402_p1, %s1557_s9, 1  ;;  %v410_v5 = vld [vmem:[%s340_s11] sm:$0xff]  ;;  %vm461_vm3 = vcmask 15360   ;;  %v1764_v47 = vld [vmem:[%s355_s0] sm:$0xff] }
  0x4c   : > { %436 = vmatpush.msra.mxu0 %v413_v1  ;;  %v1274_v6 = vld [vmem:[%s1886_s2] ss:$0 sm:$0xff]  ;;  %s1464_s11 = smov 1   ;;  %s1466_s19 = smov 95   ;;  %v555_v54 = vld [vmem:[#allocation5] sm:$0xff] }
  0x4d   : > { %s1157_s13 = sshll.u32 %s1688_s12, 3  ;;  %s1467_s14 = smov 105   ;;  %574 = vmatpush.msra.mxu3 %v555_v54 }
  0x4e   : > { %s405_s10 = scalar_lea.vmem %s1889_s5, %s1157_s13  ;;  %437 = vmatpush.msra.mxu0 %v412_v2  ;;  %s409_s23 = scalar_lea.vmem %s1890_s6, %s1157_s13 }
  0x4f   : > { %v1705_v3 = vld [vmem:[%s405_s10] sm:$0xff]  ;;  %s1463_s10 = smov 119   ;;  %s1468_s24 = smov 120  }
  0x50   : > { %471 = vrot.lane.b32.xlu1 %v1705_v3, %s1461_s25  ;;  %438 = vmatpush.msra.mxu0 %v411_v4  ;;  %v1732_v12 = vld [vmem:[%s409_s23] sm:$0xff]  ;;  %s1469_s29 = smov 103   ;;  %s1470_s12 = smov 32  }
  0x51   : > { %1159 = vmatmul.msk.f32.vlgmr.msra.gmra.mxu0 %vm419_vm0, %v410_v5  ;;  %s1471_s13 = smov 24   ;;  %s1473_s3 = smov 112  }
  0x52   : > { %s1474_s22 = smov 96   ;;  %s1480_s0 = smov 55  }
  0x53   : > { %s1482_s21 = smov 48   ;;  %s1483_s16 = smov 47  }
  0x54   : > { %s1484_s23 = smov 72  }
  0xc2   : > { %v472_v15 = vpop.permute.xlu1 %471 }
  0xce   : > { %v440_v7 = vpop.f32.mrf.mxu0 }
  0xcf   : > { %v1716_v8 = vadd.f32 %v1274_v6, %v440_v7 }
  0xd1   : > { %v1719_v9 = vsub.f32 0.0, %v1716_v8  ;;  %v474_v16 = vmul.f32 %v472_v15, %v1716_v8  ;;  %v458_v23 = vmul.f32 %v1705_v3, %v1716_v8 }
  0xd3   : > { %449 = vrot.lane.b32.xlu2 %v1719_v9, %s1462_s26  ;;  %463 = vrot.lane.b32.xlu0 %v1719_v9, %s1463_s10  ;;  %s1475_s26 = smov 104   ;;  %s1476_s10 = smov 88  }
  0xdb   : > { %453 = vrot.lane.b32.xlu2 %v1716_v8, %s1464_s11  ;;  %466 = vrot.lane.b32.xlu0 %v1716_v8, %s1465_s18  ;;  %s1477_s11 = smov 73   ;;  %s1478_s18 = smov 79  }
  0xe3   : > { %608 = vrot.lane.b32.xlu2 %v1719_v9, %s1466_s19  ;;  %s1479_s19 = smov 81  }
  0xeb   : > { %586 = vrot.lane.b32.xlu2 %v1716_v8, %s1467_s14  ;;  %s1481_s14 = smov 56  }
 0x12d   : > { %v450_v19 = vpop.permute.xlu2 %449 }
 0x135   : > { %v454_v20 = vpop.permute.xlu2 %453 }
 0x136   : > { %v457_v21 = vsel %vm456_vm1, %v450_v19, %v454_v20 }
 0x137   : > { %v459_v22 = vmul.f32 %v457_v21, %v1732_v12 }
 0x139   : > { %v460_v24 = vadd.f32 %v459_v22, %v458_v23 }
 0x13b   : > { %v462_v29 = vsel %vm461_vm3, %v460_v24, %v1716_v8 }
 0x13d   : > { %v609_v28 = vpop.permute.xlu2 %608 }
 0x145   : > { %v464_v10 = vpop.permute.xlu0 %463  ;;  %v587_v34 = vpop.permute.xlu2 %586 }
 0x14d   : > { %v467_v11 = vpop.permute.xlu0 %466 }
 0x14e   : > { %v469_v13 = vsel %vm456_vm1, %v464_v10, %v467_v11 }
 0x14f   : > { %v475_v14 = vmul.f32 %v469_v13, %v1732_v12 }
 0x151   : > { %477 = vrot.lane.b32.xlu1 %v475_v14, %s1461_s25  ;;  %s1472_s25 = smov 97  }
 0x159   : > { %485 = vrot.lane.b32.xlu1 %v1716_v8, %s1468_s24 }
 0x161   : > { %583 = vrot.lane.b32.xlu1 %v1719_v9, %s1469_s29  ;;  %s1486_s29 = smov 49  }
 0x169   : > { %615 = vrot.lane.b32.xlu1 %v1705_v3, %s1470_s12 }
 0x171   : > { %590 = vrot.lane.b32.xlu1 %v1705_v3, %s1471_s13 }
 0x1c3   : > { %v478_v17 = vpop.permute.xlu1 %477 }
 0x1c4   : > { %v480_v18 = vadd.f32 %v478_v17, %v474_v16 }
 0x1c6   : > { %482 = vrot.lane.b32.xlu0 %v480_v18, %s1468_s24  ;;  %s1485_s24 = smov 71  }
 0x1cb   : > { %v486_v25 = vpop.permute.xlu1 %485 }
 0x1ce   : > { %611 = vrot.lane.b32.xlu0 %v1716_v8, %s1472_s25  ;;  %s1489_s25 = smov 64  }
 0x1d3   : > { %v584_v33 = vpop.permute.xlu1 %583 }
 0x1d4   : > { %v589_v35 = vsel %vm456_vm1, %v584_v33, %v587_v34 }
 0x1d5   : > { %v594_v36 = vmul.f32 %v589_v35, %v1732_v12 }
 0x1db   : > { %v616_v37 = vpop.permute.xlu1 %615 }
 0x1dc   : > { %v618_v38 = vmul.f32 %v616_v37, %v1716_v8 }
 0x1e3   : > { %v591_v42 = vpop.permute.xlu1 %590 }
 0x1e4   : > { %v593_v43 = vmul.f32 %v591_v42, %v1716_v8 }
 0x238   : > { %v483_v26 = vpop.permute.xlu0 %482 }
 0x239   : > { %v488_v27 = vsel %vm461_vm3, %v483_v26, %v486_v25 }
 0x23a   : > { %1160 = vmatpush.xpose.msk.msra.mxu1 %vm489_vm2, %v488_v27 }
 0x23d   : > { %1161 = vmatmul.msk.f32.vlgmr.msra.gmra.mxu1 %vm489_vm2, %v462_v29 }
 0x240   : > { %v612_v30 = vpop.permute.xlu0 %611 }
 0x241   : > { %v614_v31 = vsel %vm456_vm1, %v609_v28, %v612_v30 }
 0x242   : > { %v619_v32 = vmul.f32 %v614_v31, %v1732_v12 }
 0x244   : > { %621 = vrot.lane.b32.xlu2 %v619_v32, %s1470_s12  ;;  %s1487_s12 = smov 57  }
 0x24c   : > { %596 = vrot.lane.b32.xlu2 %v594_v36, %s1471_s13  ;;  %s1488_s13 = smov 80  }
 0x254   : > { %529 = vrot.lane.b32.xlu2 %v1716_v8, %s1473_s3  ;;  %s1490_s3 = smov 40  }
 0x29e   : > { %v622_v39 = vpop.permute.xlu2 %621 }
 0x29f   : > { %v624_v40 = vadd.f32 %v622_v39, %v618_v38 }
 0x2a1   : > { %626 = vrot.lane.b32.xlu2 %v624_v40, %s1474_s22  ;;  %v698_v40 = vld [vmem:[#allocation5 + $0x8] sm:$0xff] }
 0x2a2   : > { %717 = vmatpush.msrb.mxu1 %v698_v40 }
 0x2a6   : > { %v597_v41 = vpop.permute.xlu2 %596 }
 0x2a7   : > { %v599_v45 = vadd.f32 %v597_v41, %v593_v43 }
 0x2a9   : > { %629 = vrot.lane.b32.xlu2 %v1716_v8, %s1474_s22 }
 0x2ae   : > { %v530_v44 = vpop.permute.xlu2 %529 }
 0x2af   : > { %550 = vmatpush.msra.mxu2 %v530_v44 }
 0x2b1   : > { %601 = vrot.lane.b32.xlu2 %v599_v45, %s1475_s26 }
 0x2ba   : > { %v513_v46 = vpop.f32.mrf.mxu1 }
 0x2bb   : > { %v516_v48 = vmul.f32 0.35355338, %v513_v46 }
 0x2bd   : > { %v517_v49 = vadd.f32 %v516_v48, %v1764_v47 }
 0x2bf   : > { %v518_v50 = vsel %vm489_vm2, %v517_v49, -inf }
 0x2c0   : > { %519 = vmax.xlane.f32.xlu0 %v518_v50 }
 0x2d4   : > { %604 = vrot.lane.b32.xlu0 %v1716_v8, %s1475_s26 }
 0x2dc   : > { %672 = vrot.lane.b32.xlu0 %v1716_v8, %s1476_s10  ;;  %s1177_s10 = sshll.u32 %s1557_s9, 3  ;;  %s1005_s9 = scalar_lea.sflag [#allocation4], %s338_s20 }
 0x2e4   : > { %751 = vrot.lane.b32.xlu0 %v1716_v8, %s1477_s11 }
 0x2ec   : > { %723 = vrot.lane.b32.xlu0 %v1719_v9, %s1478_s18 }
 0x2f4   : > { %726 = vrot.lane.b32.xlu0 %v1716_v8, %s1479_s19  ;;  %s1015_s19 = scalar_lea.hbm %s1892_s8, %s1177_s10 }
 0x2fb   : > { %v627_v51 = vpop.permute.xlu2 %626 }
 0x2fc   : > { %863 = vrot.lane.b32.xlu0 %v1719_v9, %s1480_s0  ;;  %s401_s0 = scalar_lea.vmem [#allocation8], %s1670_s30 }
 0x303   : > { %v630_v52 = vpop.permute.xlu2 %629 }
 0x304   : > { %755 = vrot.lane.b32.xlu0 %v1705_v3, %s1481_s14  ;;  %v632_v53 = vsel %vm461_vm3, %v627_v51, %v630_v52 }
 0x305   : > { %1164 = vmatpush.xpose.msk.msrb.mxu2 %vm489_vm2, %v632_v53 }
 0x30b   : > { %v602_v1 = vpop.permute.xlu2 %601 }
 0x30c   : > { %730 = vrot.lane.b32.xlu0 %v1705_v3, %s1482_s21 }
 0x333   : > { %v520_v55 = vpop.xlane.xlu0 %519 }
 0x334   : > { %v521_v56 = vsub.f32 %v517_v49, %v520_v55 }
 0x336   : > { %v522_v57 = vmul.f32 1.442695, %v521_v56 }
 0x338   : > { %1276 = vpow2.f32 %v522_v57 }
 0x33e   : > { %v1277_v58 = vpop.eup %1276 }
 0x33f   : > { %v524_v59 = vsel %vm489_vm2, %v1277_v58, 0.0 }
 0x340   : > { %525 = vadd.xlane.f32.xlu1 %v524_v59 }
 0x346   : > { %v605_v60 = vpop.permute.xlu0 %604 }
 0x347   : > { %v607_v2 = vsel %vm461_vm3, %v602_v1, %v605_v60 }
 0x34e   : > { %v673_v61 = vpop.permute.xlu0 %672 }
 0x34f   : > { %693 = vmatpush.msrb.mxu3 %v673_v61 }
 0x356   : > { %v752_v11 = vpop.permute.xlu0 %751 }
 0x35e   : > { %v724_v13 = vpop.permute.xlu0 %723 }
 0x366   : > { %v727_v14 = vpop.permute.xlu0 %726 }
 0x367   : > { %v729_v15 = vsel %vm456_vm1, %v724_v13, %v727_v14 }
 0x368   : > { %v734_v16 = vmul.f32 %v729_v15, %v1732_v12 }
 0x36e   : > { %v864_v26 = vpop.permute.xlu0 %863 }
 0x376   : > { %v756_v32 = vpop.permute.xlu0 %755 }
 0x377   : > { %v758_v41 = vmul.f32 %v756_v32, %v1716_v8 }
 0x37e   : > { %v731_v36 = vpop.permute.xlu0 %730 }
 0x37f   : > { %v733_v38 = vmul.f32 %v731_v36, %v1716_v8 }
 0x3b3   : > { %v526_v62 = vpop.xlane.xlu1 %525 }
 0x3b4   : > { %1278 = vrcp.f32 %v526_v62 }
 0x3ba   : > { %v1279_v63 = vpop.eup %1278 }
 0x3bb   : > { %v528_v0 = vmul.f32 %v1279_v63, %v1277_v58 }
 0x3bd   : > { %1162 = vmatmul.msk.f32.vlgmr.msra.gmra.mxu2 %vm489_vm2, %v528_v0 }
 0x3c5   : > { %1165 = vmatmul.msk.f32.vlgmr.msrb.gmra.mxu2 %vm489_vm2, %v607_v2 }
 0x440   : > { %v552_v4 = vpop.f32.mrf.mxu2 }
 0x441   : > { %1163 = vmatmul.msk.f32.vlgmr.msra.gmra.mxu3 %vm489_vm2, %v552_v4 }
 0x448   : > { %v656_v5 = vpop.f32.mrf.mxu2 }
 0x449   : > { %v659_v6 = vmul.f32 0.35355338, %v656_v5 }
 0x44b   : > { %v660_v7 = vadd.f32 %v659_v6, %v1764_v47 }
 0x44d   : > { %v661_v10 = vsel %vm489_vm2, %v660_v7, -inf }
 0x44e   : > { %662 = vmax.xlane.f32.xlu2 %v661_v10 }
 0x466   : > { %888 = vrot.lane.b32.xlu2 %v1719_v9, %s1483_s16 }
 0x46e   : > { %736 = vrot.lane.b32.xlu2 %v734_v16, %s1482_s21 }
 0x476   : > { %870 = vrot.lane.b32.xlu2 %v1705_v3, %s1484_s23 }
 0x47e   : > { %769 = vrot.lane.b32.xlu2 %v1716_v8, %s1484_s23 }
 0x4c1   : > { %v663_v17 = vpop.xlane.xlu2 %662 }
 0x4c2   : > { %v664_v18 = vsub.f32 %v660_v7, %v663_v17 }
 0x4c4   : > { %v665_v19 = vmul.f32 1.442695, %v664_v18 }
 0x4c6   : > { %1280 = vpow2.f32 %v665_v19 }
 0x4cc   : > { %v1281_v20 = vpop.eup %1280 }
 0x4cd   : > { %v667_v21 = vsel %vm489_vm2, %v1281_v20, 0.0 }
 0x4ce   : > { %668 = vadd.xlane.f32.xlu1 %v667_v21 }
 0x4e7   : > { %748 = vrot.lane.b32.xlu1 %v1719_v9, %s1485_s24  ;;  %v889_v9 = vpop.permute.xlu2 %888 }
 0x4ef   : > { %891 = vrot.lane.b32.xlu1 %v1716_v8, %s1486_s29  ;;  %v737_v37 = vpop.permute.xlu2 %736  ;;  %s1402_s29 = scalar_lea.hbm %s1892_s8, 16 }
 0x4f0   : > { %v739_v39 = vadd.f32 %v737_v37, %v733_v38 }
 0x4f7   : > { %866 = vrot.lane.b32.xlu1 %v1716_v8, %s1487_s12  ;;  %v871_v49 = vpop.permute.xlu2 %870 }
 0x4f8   : > { %v873_v50 = vmul.f32 %v871_v49, %v1716_v8 }
 0x4ff   : > { %v770_v54 = vpop.permute.xlu2 %769 }
 0x541   : > { %v669_v22 = vpop.xlane.xlu1 %668 }
 0x542   : > { %1282 = vrcp.f32 %v669_v22 }
 0x548   : > { %v1283_v23 = vpop.eup %1282 }
 0x549   : > { %v671_v24 = vmul.f32 %v1283_v23, %v1281_v20 }
 0x54b   : > { %1166 = vmatmul.msk.f32.vlgmr.msrb.gmra.mxu3 %vm489_vm2, %v671_v24  ;;  %v838_v24 = vld [vmem:[#allocation5 + $0x10] sm:$0xff] }
 0x54c   : > { %857 = vmatpush.msra.mxu3 %v838_v24 }
 0x559   : > { %v749_v25 = vpop.permute.xlu1 %748 }
 0x55a   : > { %v754_v27 = vsel %vm456_vm1, %v749_v25, %v752_v11  ;;  %v978_v25 = vld [vmem:[#allocation5 + $0x18] sm:$0xff] }
 0x55b   : > { %v759_v28 = vmul.f32 %v754_v27, %v1732_v12 }
 0x55d   : > { %761 = vrot.lane.b32.xlu1 %v759_v28, %s1481_s14 }
 0x561   : > { %v892_v29 = vpop.permute.xlu1 %891 }
 0x562   : > { %v894_v30 = vsel %vm456_vm1, %v889_v9, %v892_v29 }
 0x563   : > { %v899_v31 = vmul.f32 %v894_v30, %v1732_v12 }
 0x565   : > { %895 = vrot.lane.b32.xlu1 %v1705_v3, %s1488_s13  ;;  %901 = vrot.lane.b32.xlu0 %v899_v31, %s1488_s13  ;;  %v1812_v3 = vpop.f32.mrf.mxu3 }
 0x569   : > { %v867_v33 = vpop.permute.xlu1 %866 }
 0x56a   : > { %v869_v34 = vsel %vm456_vm1, %v864_v26, %v867_v33  ;;  %v1275_v33 = vld [vmem:[%s1888_s4] ss:$0 sm:$0xff] }
 0x56b   : > { %v874_v35 = vmul.f32 %v869_v34, %v1732_v12  ;;  %v582_v34 = vadd.f32 %v1275_v33, %v1812_v3 }
 0x56d   : > { %876 = vrot.lane.b32.xlu1 %v874_v35, %s1484_s23 }
 0x575   : > { %741 = vrot.lane.b32.xlu1 %v739_v39, %s1488_s13 }
 0x57d   : > { %909 = vrot.lane.b32.xlu1 %v1716_v8, %s1482_s21 }
 0x5ce   : > { %v695_v42 = vpop.f32.mrf.mxu3 }
 0x5cf   : > { %v762_v43 = vpop.permute.xlu1 %761  ;;  %1167 = vmatmul.msk.f32.vlgmr.msrb.gmra.mxu1 %vm489_vm2, %v695_v42 }
 0x5d0   : > { %v764_v12 = vadd.f32 %v762_v43, %v758_v41 }
 0x5d2   : > { %766 = vrot.lane.b32.xlu0 %v764_v12, %s1484_s23 }
 0x5d7   : > { %v896_v44 = vpop.permute.xlu1 %895  ;;  %v902_v46 = vpop.permute.xlu0 %901 }
 0x5d8   : > { %v898_v45 = vmul.f32 %v896_v44, %v1716_v8 }
 0x5da   : > { %v904_v48 = vadd.f32 %v902_v46, %v898_v45  ;;  %744 = vrot.lane.b32.xlu0 %v1716_v8, %s1488_s13 }
 0x5dc   : > { %906 = vrot.lane.b32.xlu2 %v904_v48, %s1482_s21  ;;  %s1019_s21 = sshll.u32 %s1015_s19, 4  ;;  %s1020_s21 = int_to_ptr.hbm [resolvable:$true] %s1019_s21 }
 0x5dd   : > { %s1396_s16 = sshra.s32 %s1020_s21, 4  ;;  %s1397_s16 = int_to_ptr.hbm [resolvable:$true] %s1396_s16 }
 0x5de   : > { %s1398_s23 = scalar_lea.hbm %s1397_s16, 8  ;;  %p1403_p13 = scmp.lt.s32.totalorder %s1397_s16, %s1892_s8 }
 0x5df   : > { %v877_v51 = vpop.permute.xlu1 %876  ;;  %p1399_p0 = scmp.ne.s32.totalorder %s1397_s16, %s1398_s23  ;;  %p1404_p6 = scmp.lt.s32.totalorder %s1402_s29, %s1398_s23 }
 0x5e0   : > { %v879_v52 = vadd.f32 %v877_v51, %v873_v50 }
 0x5e1   : > { %p1400_p8 = pnand %p1399_p0, %p1575_p5  ;;  %p1405_p7 = por %p1404_p6, %p1403_p13 }
 0x5e2   : > { %881 = vrot.lane.b32.xlu0 %v879_v52, %s1481_s14 }
 0x5e3   : > { %p1401_p4 = pneg %p1400_p8 }
 0x5e4   : > { %884 = vrot.lane.b32.xlu2 %v1716_v8, %s1481_s14  ;;  %s1017_s14 = sshll.u32 %s401_s0, 4  ;;  %s1018_s14 = int_to_ptr.vmem [resolvable:$true] %s1017_s14 }
 0x5e5   : > { %p1406_p10 = pnand %p1405_p7, %p1401_p4 }
 0x5e7   : > { %v742_v53 = vpop.permute.xlu1 %741 }
 0x5ef   : > { %v910_v55 = vpop.permute.xlu1 %909 }
 0x636   : > { %v907_v56 = vpop.permute.xlu2 %906 }
 0x637   : > { %v912_v57 = vsel %vm461_vm3, %v907_v56, %v910_v55 }
 0x638   : > { %1172 = vmatpush.xpose.msk.msra.mxu1 %vm489_vm2, %v912_v57 }
 0x63e   : > { %v885_v62 = vpop.permute.xlu2 %884 }
 0x644   : > { %v767_v58 = vpop.permute.xlu0 %766 }
 0x645   : > { %v772_v59 = vsel %vm461_vm3, %v767_v58, %v770_v54 }
 0x646   : > { %1168 = vmatpush.xpose.msk.msrb.mxu0 %vm489_vm2, %v772_v59 }
 0x64c   : > { %v745_v60 = vpop.permute.xlu0 %744  ;;  %v719_v1 = vpop.f32.mrf.mxu1 }
 0x64d   : > { %v747_v61 = vsel %vm461_vm3, %v742_v53, %v745_v60  ;;  %v722_v35 = vadd.f32 %v719_v1, %v582_v34 }
 0x64e   : > { %1169 = vmatmul.msk.f32.vlgmr.msrb.gmra.mxu0 %vm489_vm2, %v747_v61 }
 0x654   : > { %v882_v63 = vpop.permute.xlu0 %881 }
 0x655   : > { %v887_v0 = vsel %vm461_vm3, %v882_v63, %v885_v62 }
 0x656   : > { %1173 = vmatmul.msk.f32.vlgmr.msra.gmra.mxu1 %vm489_vm2, %v887_v0 }
 0x6cb   : > { %v796_v2 = vpop.f32.mrf.mxu0 }
 0x6cc   : > { %v799_v4 = vmul.f32 0.35355338, %v796_v2 }
 0x6ce   : > { %v800_v5 = vadd.f32 %v799_v4, %v1764_v47 }
 0x6d0   : > { %v801_v6 = vsel %vm489_vm2, %v800_v5, -inf }
 0x6d1   : > { %802 = vmax.xlane.f32.xlu1 %v801_v6 }
 0x6d3   : > { %v936_v7 = vpop.f32.mrf.mxu1 }
 0x6d4   : > { %v939_v10 = vmul.f32 0.35355338, %v936_v7 }
 0x6d6   : > { %v940_v11 = vadd.f32 %v939_v10, %v1764_v47 }
 0x6d8   : > { %v941_v13 = vsel %vm489_vm2, %v940_v11, -inf }
 0x6d9   : > { %942 = vmax.xlane.f32.xlu0 %v941_v13 }
 0x6ed   : > { %812 = vrot.lane.b32.xlu0 %v1716_v8, %s1489_s25 }
 0x744   : > { %v803_v14 = vpop.xlane.xlu1 %802 }
 0x745   : > { %v804_v15 = vsub.f32 %v800_v5, %v803_v14 }
 0x747   : > { %v805_v16 = vmul.f32 1.442695, %v804_v15 }
 0x749   : > { %1284 = vpow2.f32 %v805_v16 }
 0x74c   : > { %v943_v17 = vpop.xlane.xlu0 %942 }
 0x74d   : > { %v944_v18 = vsub.f32 %v940_v11, %v943_v17 }
 0x74f   : > { %v1285_v19 = vpop.eup %1284  ;;  %v945_v20 = vmul.f32 1.442695, %v944_v18 }
 0x750   : > { %v807_v21 = vsel %vm489_vm2, %v1285_v19, 0.0 }
 0x751   : > { %1286 = vpow2.f32 %v945_v20  ;;  %808 = vadd.xlane.f32.xlu2 %v807_v21 }
 0x757   : > { %v1287_v22 = vpop.eup %1286 }
 0x758   : > { %v947_v47 = vsel %vm489_vm2, %v1287_v22, 0.0 }
 0x759   : > { %948 = vadd.xlane.f32.xlu1 %v947_v47 }
 0x75f   : > { %v813_v23 = vpop.permute.xlu0 %812 }
 0x760   : > { %833 = vmatpush.msra.mxu2 %v813_v23 }
 0x762   : > { %997 = vmatpush.msrb.mxu2 %v978_v25 }
 0x769   : > { %952 = vrot.lane.b32.xlu2 %v1716_v8, %s1490_s3 }
 0x7c4   : > { %v809_v26 = vpop.xlane.xlu2 %808 }
 0x7c5   : > { %1288 = vrcp.f32 %v809_v26 }
 0x7cb   : > { %v1289_v27 = vpop.eup %1288 }
 0x7cc   : > { %v811_v28 = vmul.f32 %v1289_v27, %v1285_v19  ;;  %v953_v9 = vpop.permute.xlu2 %952  ;;  %v949_v29 = vpop.xlane.xlu1 %948 }
 0x7cd   : > { %1290 = vrcp.f32 %v949_v29  ;;  %973 = vmatpush.msra.mxu0 %v953_v9 }
 0x7ce   : > { %1170 = vmatmul.msk.f32.vlgmr.msra.gmra.mxu2 %vm489_vm2, %v811_v28 }
 0x7d3   : > { %v1291_v30 = vpop.eup %1290 }
 0x7d4   : > { %v951_v31 = vmul.f32 %v1291_v30, %v1287_v22 }
 0x7d6   : > { %1174 = vmatmul.msk.f32.vlgmr.msra.gmra.mxu0 %vm489_vm2, %v951_v31 }
 0x851   : > { %v835_v8 = vpop.f32.mrf.mxu2 }
 0x852   : > { %1171 = vmatmul.msk.f32.vlgmr.msra.gmra.mxu3 %vm489_vm2, %v835_v8 }
 0x853   : > { %v975_v32 = vpop.f32.mrf.mxu0 }
 0x854   : > { %1175 = vmatmul.msk.f32.vlgmr.msrb.gmra.mxu2 %vm489_vm2, %v975_v32 }
 0x8d5   : > { %v859_v36 = vpop.f32.mrf.mxu3 }
 0x8d6   : > { %v862_v37 = vadd.f32 %v859_v36, %v722_v35 }
 0x8d7   : > { %v999_v38 = vpop.f32.mrf.mxu2 }
 0x8d8   : > { %v1002_v39 = vadd.f32 %v999_v38, %v862_v37 }
 0x8da   : > { %1003 = vst.msk [vmem:[%s401_s0] sm:$0xff] %vm419_vm0, %v1002_v39 }
 0x8db   : > { %1409 = shalt.err (!%p1406_p10)
}
 0x8dc   : > { %1188 = dma.vmem_to_hbm [thread:$0]  (%p1575_p5), %s1018_s14, 128, %s1020_s21, %s1005_s9  }
 0x8dd PF: > { %s1914_s20 = sld [smem:[#allocation14_spill]]  ;;  %s1031_s25 = sand.u32 1, %s1444_s27  }
 0x8de   : > { %s1032_s3 = scalar_lea.sflag [#allocation4], %s1031_s25 }
 0x8e3   : > { %p1915_p2 = scmp.ge.s32.totalorder %s1914_s20, 2 }
 0x8e5   : > { %p1202_p3 = pnand %p1915_p2, %p1587_p9 }
 0x8e7   : > { %p1203_p11 = pneg %p1202_p3 }
 0x8e9   : > { %1439 = dma.done.wait (%p1203_p11), %s1032_s3, 128  }
 0x8ea   : > { %1441 = vsyncadd (%p1203_p11), %s1032_s3, 4294967168  ;;  %s1916_s30 = sld [smem:[#allocation15_spill]]  ;;  %s1919_s27 = smov %s1448_s28 }
 0x8eb   : > { %s1917_s22 = sld [smem:[#allocation13_spill]] }
 0x8ec   : > { %s1918_s29 = sld [smem:[#allocation16_spill]] }
 0x8f0   : > { %p22_p12 = scmp.ge.s32.totalorder %s1916_s30, 4  }
 0x8f1   : > { %s1920_s28 = smov %s1917_s22 }
 0x8f2   :  { %24 = sbr.rel (!%p22_p12) target bundleno = 9 (0x9), region = 118 }
 0x8f7   :  { %1038 = vsyncpa [#allocation3], 1 }
 0x8f8   :  { %1040 = vsyncpa [#allocation3 + $0x1], 1 }
 0x8f9   :  { %1041 = vsyncpa [#allocation6], 1 }
 0x8fa   :  { %1042 = vsyncpa [#allocation4], 1 }
 0x8fb   :  { %1044 = vsyncpa [#allocation4 + $0x1], 1 }

</bundles_post_ra>
